<compile_context>
chip_gen: v5e
topology: v5e:2x2
jax: 0.10.0
libtpu: 0.0.40
codegen_flags: <defaults>
</compile_context>

<pallas_src>
import jax
import jax.numpy as jnp
from jax.experimental import pallas as pl
from jax.experimental.pallas import tpu as pltpu


def _round_up(x: int, m: int) -> int:
    return (x + m - 1) // m * m


def _protac_kernel(poi_ref, e3_ref, cell_ref, smi_ref,
                   wp_ref, we_ref, wc_ref, ws_ref,
                   bbr_ref, ones_ref, w1_ref, aux_ref, out_ref):
    """Fused forward for one batch tile.

    poi/e3/cell/smi : (TB, d_j) f32   raw embeddings (cast to bf16 on-chip)
    wp/we/wc/ws     : (d_j, 4H) bf16  branch weight lifted into column segment j
    bbr             : (1, 4H)   f32   concatenated branch biases
    ones            : (4H, 4H)  f32   block-diagonal ones (segment-sum matmul)
    w1              : (4H, H)   bf16  fc1 weight replicated 4x along rows
    aux             : (1, >=2H+1) f32 packed [b1 | w3 row | b3]
    out             : (TB, 1)   f32   fc3 output
    """
    H = w1_ref.shape[1]
    f32 = jnp.float32
    bf16 = jnp.bfloat16

    # --- 4 branch Linears: lane-dense MXU dots; sum == block-diagonal matmul --
    z = (jnp.dot(poi_ref[...].astype(bf16), wp_ref[...], preferred_element_type=f32)
         + jnp.dot(e3_ref[...].astype(bf16), we_ref[...], preferred_element_type=f32)
         + jnp.dot(cell_ref[...].astype(bf16), wc_ref[...], preferred_element_type=f32)
         + jnp.dot(smi_ref[...].astype(bf16), ws_ref[...], preferred_element_type=f32)
         + bbr_ref[...])                                   # (TB, 4H) f32

    # --- lane-dense per-segment softmax -------------------------------------
    # Softmax is shift-invariant, so a single global row max is valid for all
    # four segments (exponents <= 0, no overflow; underflow only if a whole
    # segment sits ~88 below the global max, which these magnitudes never hit).
    m = jnp.max(z, axis=-1, keepdims=True)                 # (TB, 1)
    e = jnp.exp(z - m)                                     # (TB, 4H), full-lane EUP
    # Per-segment sums broadcast back to every lane of the segment via one
    # block-diagonal ones matmul (keeps the VPU/EUP lane-dense; MXU has slack).
    denom = jnp.dot(e, ones_ref[...], preferred_element_type=f32)   # (TB, 4H)
    p = e * pl.reciprocal(denom, approx=False)             # 4 softmaxes, side by side

    aux = aux_ref[...]
    b1 = aux[:, 0:H]                  # (1, H)
    w3_row = aux[:, H:2 * H]          # (1, H)
    b3 = aux[:, 2 * H:2 * H + 1]      # (1, 1)

    # --- sum-join + fc1 folded: h @ w1 == p @ vstack([w1]*4); then ReLU ------
    x1 = jnp.dot(p.astype(bf16), w1_ref[...], preferred_element_type=f32) + b1
    x1 = jnp.maximum(x1, 0.0)         # (TB, H) f32

    # --- dropout == identity (eval); fc3 with N=1 on the VPU/XLU -------------
    out_ref[...] = jnp.sum(x1 * w3_row, axis=-1, keepdims=True) + b3


def pack_params(params, hidden_dim):
    """Host-side, one-time packing of the model parameters.

    Branch weights are lifted to (d_j, 4H) bf16 with the real block placed in
    column segment j (off-segment columns exactly zero), fc1 is row-replicated
    to (4H, H) bf16, biases / fc3 row are packed into small f32 rows.
    """
    H = hidden_dim
    ws_ = [params["wp"], params["we"], params["wc"], params["ws"]]
    bs_ = [params["bp"], params["be"], params["bc"], params["bs"]]
    dims = [int(w.shape[0]) for w in ws_]
    K = sum(dims)

    branch_w = []
    for j, w in enumerate(ws_):
        wj = jnp.zeros((int(w.shape[0]), 4 * H), jnp.float32)
        wj = wj.at[:, j * H:(j + 1) * H].set(w)
        branch_w.append(wj.astype(jnp.bfloat16))
    bbr = jnp.concatenate(bs_, axis=1)                            # (1, 4H) f32

    seg = jnp.arange(4 * H) // H
    ones_bd = (seg[:, None] == seg[None, :]).astype(jnp.float32)  # (4H, 4H)

    w1rep = jnp.concatenate([params["w1"]] * 4, axis=0).astype(jnp.bfloat16)  # (4H, H)

    aux_w = max(128, _round_up(2 * H + 1, 128))
    aux = jnp.zeros((1, aux_w), jnp.float32)
    aux = aux.at[:, 0:H].set(params["b1"])
    aux = aux.at[:, H:2 * H].set(params["w3"].reshape(1, H))
    aux = aux.at[:, 2 * H:2 * H + 1].set(params["b3"])

    return dict(branch_w=tuple(branch_w), bbr=bbr, ones_bd=ones_bd,
                w1rep=w1rep, aux=aux, dims=tuple(dims), K=K, H=H)


def protac_forward(poi, e3, cell, smi, packed, *, tb=4096, min_tiles=4):
    """Runs the fused PROTAC_Predictor forward pass on TPU via Pallas.

    tb:        requested batch tile (clamped to a multiple of 8).
    min_tiles: cap TB so the parallel grid axis has >= min_tiles steps when B
               allows, so both v7x TensorCores get work (no-op on v5e/v6e).
    """
    H, K = packed["H"], packed["K"]
    B = int(poi.shape[0])

    TB = max(8, (min(tb, _round_up(B, 8)) // 8) * 8)
    cap = _round_up(max(8, -(-B // min_tiles)), 8)
    TB = min(TB, cap)
    grid = pl.cdiv(B, TB)   # ragged batch: last block partial, OOB writes masked

    wp4, we4, wc4, ws4 = packed["branch_w"]
    bbr, ones_bd = packed["bbr"], packed["ones_bd"]
    w1rep, aux = packed["w1rep"], packed["aux"]

    def batch_spec(d):
        return pl.BlockSpec((TB, int(d)), lambda i: (i, 0))

    def const_spec(arr):
        return pl.BlockSpec(tuple(int(d) for d in arr.shape), lambda i: (0, 0))

    # Advisory cost hint for XLA scheduling around this memory-bound call.
    flops = 2 * B * (K * 4 * H + 4 * H * 4 * H + 4 * H * H + H)
    bytes_accessed = (4 * B * K                       # f32 activations in
                      + 2 * K * 4 * H + 4 * 4 * H     # bf16 branch weights + bias
                      + 4 * 16 * H * H                # ones block-diagonal (f32)
                      + 2 * 4 * H * H                 # w1 replicated (bf16)
                      + 4 * aux.shape[1]              # aux row
                      + 4 * B)                        # f32 output
    cost = pl.CostEstimate(flops=int(flops), transcendentals=int(B * 4 * H),
                           bytes_accessed=int(bytes_accessed))

    return pl.pallas_call(
        _protac_kernel,
        out_shape=jax.ShapeDtypeStruct((B, 1), jnp.float32),
        grid=(grid,),
        in_specs=[
            batch_spec(poi.shape[1]),   # activations: batch-tiled, f32, no copies
            batch_spec(e3.shape[1]),
            batch_spec(cell.shape[1]),
            batch_spec(smi.shape[1]),
            const_spec(wp4),            # weights: constant index map -> VMEM resident
            const_spec(we4),
            const_spec(wc4),
            const_spec(ws4),
            const_spec(bbr),
            const_spec(ones_bd),
            const_spec(w1rep),
            const_spec(aux),
        ],
        out_specs=pl.BlockSpec((TB, 1), lambda i: (i, 0)),
        compiler_params=pltpu.CompilerParams(
            dimension_semantics=("parallel",),        # 2-TC batch split on v7x
            vmem_limit_bytes=48 * 1024 * 1024,        # room for TB=4096 f32 tiles
        ),
        cost_estimate=cost,
    )(poi, e3, cell, smi, wp4, we4, wc4, ws4, bbr, ones_bd, w1rep, aux)


def _init_params(key, hidden_dim, poi_dim, e3_dim, cell_dim, smiles_dim):
    """Deterministic synthetic parameters (stored as (in, out) + (1, out))."""
    ks = jax.random.split(key, 12)

    def lin(kw, kb, d_in, d_out, scale=0.1):
        w = scale * jax.random.normal(kw, (d_in, d_out), jnp.float32)
        b = scale * jax.random.normal(kb, (1, d_out), jnp.float32)
        return w, b

    wp, bp = lin(ks[0], ks[1], poi_dim, hidden_dim)
    we, be = lin(ks[2], ks[3], e3_dim, hidden_dim)
    wc, bc = lin(ks[4], ks[5], cell_dim, hidden_dim)
    ws, bs = lin(ks[6], ks[7], smiles_dim, hidden_dim)
    w1, b1 = lin(ks[8], ks[9], hidden_dim, hidden_dim)
    w3, b3 = lin(ks[10], ks[11], hidden_dim, 1)
    return dict(wp=wp, bp=bp, we=we, be=be, wc=wc, bc=bc, ws=ws, bs=bs,
                w1=w1, b1=b1, w3=w3, b3=b3)


def _reference_forward(poi, e3, cell, smi, p):
    """Pure-JAX f32 reference mirroring the PyTorch forward (sum join, eval)."""
    def branch(x, w, b):
        return jax.nn.softmax(x @ w + b, axis=1)
    h = (branch(poi, p["wp"], p["bp"]) + branch(e3, p["we"], p["be"])
         + branch(cell, p["wc"], p["bc"]) + branch(smi, p["ws"], p["bs"]))
    x = jax.nn.relu(h @ p["w1"] + p["b1"])
    return x @ p["w3"] + p["b3"]


if __name__ == "__main__":
    # Small, forward-consistent shapes:
    #   hidden_dim=32, protein_embedding_size=48 (poi & e3),
    #   cell_embedding_size=40, fingerprint_size (smiles)=64.
    B, HIDDEN = 8, 32
    POI_DIM = E3_DIM = 48
    CELL_DIM = 40
    SMILES_DIM = 64

    key = jax.random.PRNGKey(0)
    k_poi, k_e3, k_cell, k_smi, k_par, k_big = jax.random.split(key, 6)

    poi = jax.random.normal(k_poi, (B, POI_DIM), jnp.float32)
    e3 = jax.random.normal(k_e3, (B, E3_DIM), jnp.float32)
    cell = jax.random.normal(k_cell, (B, CELL_DIM), jnp.float32)
    smi = jax.random.normal(k_smi, (B, SMILES_DIM), jnp.float32)

    params = _init_params(k_par, HIDDEN, POI_DIM, E3_DIM, CELL_DIM, SMILES_DIM)
    packed = pack_params(params, HIDDEN)

    # Single-tile path.
    out = protac_forward(poi, e3, cell, smi, packed)
    out = jax.block_until_ready(out)
    ref = _reference_forward(poi, e3, cell, smi, params)
    assert out.shape == (B, 1)
    assert jnp.allclose(out, ref, atol=1e-2, rtol=1e-2), "mismatch vs reference (B=8)"

    # Multi-tile grid with a ragged batch (exercises partial final block,
    # pipelined BlockSpecs and the multi-tile parallel axis).
    B2 = 300
    kk = jax.random.split(k_big, 4)
    poi2 = jax.random.normal(kk[0], (B2, POI_DIM), jnp.float32)
    e32 = jax.random.normal(kk[1], (B2, E3_DIM), jnp.float32)
    cell2 = jax.random.normal(kk[2], (B2, CELL_DIM), jnp.float32)
    smi2 = jax.random.normal(kk[3], (B2, SMILES_DIM), jnp.float32)

    out2 = protac_forward(poi2, e32, cell2, smi2, packed)
    out2 = jax.block_until_ready(out2)
    ref2 = _reference_forward(poi2, e32, cell2, smi2, params)
    assert out2.shape == (B2, 1)
    assert jnp.allclose(out2, ref2, atol=1e-2, rtol=1e-2), "mismatch vs reference (B=300)"

    print("KERNEL_OK")
</pallas_src>

<mosaic_0001>
module attributes {stable_mosaic.version = 11 : i64} {
  func.func @_protac_kernel(%arg0: i32, %arg1: memref<8x48xf32, #tpu.memory_space<vmem>>, %arg2: memref<8x48xf32, #tpu.memory_space<vmem>>, %arg3: memref<8x40xf32, #tpu.memory_space<vmem>>, %arg4: memref<8x64xf32, #tpu.memory_space<vmem>>, %arg5: memref<48x128xbf16, #tpu.memory_space<vmem>>, %arg6: memref<48x128xbf16, #tpu.memory_space<vmem>>, %arg7: memref<40x128xbf16, #tpu.memory_space<vmem>>, %arg8: memref<64x128xbf16, #tpu.memory_space<vmem>>, %arg9: memref<1x128xf32, #tpu.memory_space<vmem>>, %arg10: memref<128x128xf32, #tpu.memory_space<vmem>>, %arg11: memref<128x32xbf16, #tpu.memory_space<vmem>>, %arg12: memref<1x128xf32, #tpu.memory_space<vmem>>, %arg13: memref<8x1xf32, #tpu.memory_space<vmem>>) attributes {dimension_semantics = [#tpu.dimension_semantics<parallel>], iteration_bounds = array<i64: 1>, scalar_prefetch = 0 : i64, scratch_operands = 0 : i64, tpu.core_type = #tpu.core_type<tc>, window_params = [{transform_indices = @transform_0, window_bounds = array<i64: 8, 48>}, {transform_indices = @transform_1, window_bounds = array<i64: 8, 48>}, {transform_indices = @transform_2, window_bounds = array<i64: 8, 40>}, {transform_indices = @transform_3, window_bounds = array<i64: 8, 64>}, {pipeline_mode = #tpu.pipeline_mode<synchronous>, transform_indices = @transform_4, window_bounds = array<i64: 48, 128>}, {pipeline_mode = #tpu.pipeline_mode<synchronous>, transform_indices = @transform_5, window_bounds = array<i64: 48, 128>}, {pipeline_mode = #tpu.pipeline_mode<synchronous>, transform_indices = @transform_6, window_bounds = array<i64: 40, 128>}, {pipeline_mode = #tpu.pipeline_mode<synchronous>, transform_indices = @transform_7, window_bounds = array<i64: 64, 128>}, {pipeline_mode = #tpu.pipeline_mode<synchronous>, transform_indices = @transform_8, window_bounds = array<i64: 1, 128>}, {pipeline_mode = #tpu.pipeline_mode<synchronous>, transform_indices = @transform_9, window_bounds = array<i64: 128, 128>}, {pipeline_mode = #tpu.pipeline_mode<synchronous>, transform_indices = @transform_10, window_bounds = array<i64: 128, 32>}, {pipeline_mode = #tpu.pipeline_mode<synchronous>, transform_indices = @transform_11, window_bounds = array<i64: 1, 128>}, {transform_indices = @transform_12, window_bounds = array<i64: 8, 1>}]} {
    %c0 = arith.constant 0 : index
    %c0_0 = arith.constant 0 : index
    %0 = vector.load %arg1[%c0, %c0_0] : memref<8x48xf32, #tpu.memory_space<vmem>>, vector<8x48xf32>
    %1 = arith.truncf %0 : vector<8x48xf32> to vector<8x48xbf16>
    %c0_1 = arith.constant 0 : index
    %c0_2 = arith.constant 0 : index
    %2 = vector.load %arg5[%c0_1, %c0_2] : memref<48x128xbf16, #tpu.memory_space<vmem>>, vector<48x128xbf16>
    %cst = arith.constant dense<0.000000e+00> : vector<8x128xf32>
    %3 = tpu.matmul %1, %2, %cst {dimension_numbers = #tpu.dot_dimension_numbers<[1], [0], [0], [1], [0, 0, 1, 1], [], []>} : vector<8x48xbf16>, vector<48x128xbf16>, vector<8x128xf32> -> vector<8x128xf32>
    %c0_3 = arith.constant 0 : index
    %c0_4 = arith.constant 0 : index
    %4 = vector.load %arg2[%c0_3, %c0_4] : memref<8x48xf32, #tpu.memory_space<vmem>>, vector<8x48xf32>
    %5 = arith.truncf %4 : vector<8x48xf32> to vector<8x48xbf16>
    %c0_5 = arith.constant 0 : index
    %c0_6 = arith.constant 0 : index
    %6 = vector.load %arg6[%c0_5, %c0_6] : memref<48x128xbf16, #tpu.memory_space<vmem>>, vector<48x128xbf16>
    %cst_7 = arith.constant dense<0.000000e+00> : vector<8x128xf32>
    %7 = tpu.matmul %5, %6, %cst_7 {dimension_numbers = #tpu.dot_dimension_numbers<[1], [0], [0], [1], [0, 0, 1, 1], [], []>} : vector<8x48xbf16>, vector<48x128xbf16>, vector<8x128xf32> -> vector<8x128xf32>
    %8 = arith.addf %3, %7 : vector<8x128xf32>
    %c0_8 = arith.constant 0 : index
    %c0_9 = arith.constant 0 : index
    %9 = vector.load %arg3[%c0_8, %c0_9] : memref<8x40xf32, #tpu.memory_space<vmem>>, vector<8x40xf32>
    %10 = arith.truncf %9 : vector<8x40xf32> to vector<8x40xbf16>
    %c0_10 = arith.constant 0 : index
    %c0_11 = arith.constant 0 : index
    %11 = vector.load %arg7[%c0_10, %c0_11] : memref<40x128xbf16, #tpu.memory_space<vmem>>, vector<40x128xbf16>
    %cst_12 = arith.constant dense<0.000000e+00> : vector<8x128xf32>
    %12 = tpu.matmul %10, %11, %cst_12 {dimension_numbers = #tpu.dot_dimension_numbers<[1], [0], [0], [1], [0, 0, 1, 1], [], []>} : vector<8x40xbf16>, vector<40x128xbf16>, vector<8x128xf32> -> vector<8x128xf32>
    %13 = arith.addf %8, %12 : vector<8x128xf32>
    %c0_13 = arith.constant 0 : index
    %c0_14 = arith.constant 0 : index
    %14 = vector.load %arg4[%c0_13, %c0_14] : memref<8x64xf32, #tpu.memory_space<vmem>>, vector<8x64xf32>
    %15 = arith.truncf %14 : vector<8x64xf32> to vector<8x64xbf16>
    %c0_15 = arith.constant 0 : index
    %c0_16 = arith.constant 0 : index
    %16 = vector.load %arg8[%c0_15, %c0_16] : memref<64x128xbf16, #tpu.memory_space<vmem>>, vector<64x128xbf16>
    %cst_17 = arith.constant dense<0.000000e+00> : vector<8x128xf32>
    %17 = tpu.matmul %15, %16, %cst_17 {dimension_numbers = #tpu.dot_dimension_numbers<[1], [0], [0], [1], [0, 0, 1, 1], [], []>} : vector<8x64xbf16>, vector<64x128xbf16>, vector<8x128xf32> -> vector<8x128xf32>
    %18 = arith.addf %13, %17 : vector<8x128xf32>
    %c0_18 = arith.constant 0 : index
    %c0_19 = arith.constant 0 : index
    %19 = vector.load %arg9[%c0_18, %c0_19] : memref<1x128xf32, #tpu.memory_space<vmem>>, vector<1x128xf32>
    %20 = vector.broadcast %19 : vector<1x128xf32> to vector<8x128xf32>
    %21 = arith.addf %18, %20 : vector<8x128xf32>
    %cst_20 = arith.constant dense<0xFF800000> : vector<8xf32>
    %22 = vector.multi_reduction <maximumf>, %21, %cst_20 [1] : vector<8x128xf32> to vector<8xf32>
    %23 = vector.shape_cast %22 : vector<8xf32> to vector<8x1xf32>
    %24 = vector.broadcast %23 : vector<8x1xf32> to vector<8x128xf32>
    %25 = arith.subf %21, %24 : vector<8x128xf32>
    %26 = math.exp %25 : vector<8x128xf32>
    %c0_21 = arith.constant 0 : index
    %c0_22 = arith.constant 0 : index
    %27 = vector.load %arg10[%c0_21, %c0_22] : memref<128x128xf32, #tpu.memory_space<vmem>>, vector<128x128xf32>
    %cst_23 = arith.constant dense<0.000000e+00> : vector<8x128xf32>
    %28 = tpu.matmul %26, %27, %cst_23 {dimension_numbers = #tpu.dot_dimension_numbers<[1], [0], [0], [1], [0, 0, 1, 1], [], []>} : vector<8x128xf32>, vector<128x128xf32>, vector<8x128xf32> -> vector<8x128xf32>
    %29 = tpu.reciprocal %28 : vector<8x128xf32> -> vector<8x128xf32>
    %30 = arith.mulf %26, %29 : vector<8x128xf32>
    %c0_24 = arith.constant 0 : index
    %c0_25 = arith.constant 0 : index
    %31 = vector.load %arg12[%c0_24, %c0_25] : memref<1x128xf32, #tpu.memory_space<vmem>>, vector<1x128xf32>
    %32 = vector.extract_strided_slice %31 {offsets = [0, 0], sizes = [1, 32], strides = [1, 1]} : vector<1x128xf32> to vector<1x32xf32>
    %33 = vector.extract_strided_slice %31 {offsets = [0, 32], sizes = [1, 32], strides = [1, 1]} : vector<1x128xf32> to vector<1x32xf32>
    %34 = vector.extract_strided_slice %31 {offsets = [0, 64], sizes = [1, 1], strides = [1, 1]} : vector<1x128xf32> to vector<1x1xf32>
    %35 = arith.truncf %30 : vector<8x128xf32> to vector<8x128xbf16>
    %c0_26 = arith.constant 0 : index
    %c0_27 = arith.constant 0 : index
    %36 = vector.load %arg11[%c0_26, %c0_27] : memref<128x32xbf16, #tpu.memory_space<vmem>>, vector<128x32xbf16>
    %cst_28 = arith.constant dense<0.000000e+00> : vector<8x32xf32>
    %37 = tpu.matmul %35, %36, %cst_28 {dimension_numbers = #tpu.dot_dimension_numbers<[1], [0], [0], [1], [0, 0, 1, 1], [], []>} : vector<8x128xbf16>, vector<128x32xbf16>, vector<8x32xf32> -> vector<8x32xf32>
    %38 = vector.broadcast %32 : vector<1x32xf32> to vector<8x32xf32>
    %39 = arith.addf %37, %38 : vector<8x32xf32>
    %cst_29 = arith.constant 0.000000e+00 : f32
    %40 = vector.broadcast %cst_29 : f32 to vector<8x32xf32>
    %41 = arith.maximumf %39, %40 : vector<8x32xf32>
    %42 = vector.broadcast %33 : vector<1x32xf32> to vector<8x32xf32>
    %43 = arith.mulf %41, %42 : vector<8x32xf32>
    %cst_30 = arith.constant dense<0.000000e+00> : vector<8xf32>
    %44 = vector.multi_reduction <add>, %43, %cst_30 [1] : vector<8x32xf32> to vector<8xf32>
    %45 = vector.shape_cast %44 : vector<8xf32> to vector<8x1xf32>
    %46 = vector.broadcast %34 : vector<1x1xf32> to vector<8x1xf32>
    %47 = arith.addf %45, %46 : vector<8x1xf32>
    %c0_31 = arith.constant 0 : index
    %c0_32 = arith.constant 0 : index
    %48 = vector.load %arg13[%c0_31, %c0_32] : memref<8x1xf32, #tpu.memory_space<vmem>>, vector<8x1xf32>
    tpu.vector_store %arg13[%c0_31, %c0_32], %47 {strides = array<i32>} : memref<8x1xf32, #tpu.memory_space<vmem>>, vector<8x1xf32>,
    return
  }
  func.func @transform_0(%arg0: i32) -> (i32, i32) {
    %c0_i32 = arith.constant 0 : i32
    %c0_i32_0 = arith.constant 0 : i32
    return %arg0, %c0_i32 : i32, i32
  }
  func.func @transform_1(%arg0: i32) -> (i32, i32) {
    %c0_i32 = arith.constant 0 : i32
    %c0_i32_0 = arith.constant 0 : i32
    return %arg0, %c0_i32 : i32, i32
  }
  func.func @transform_2(%arg0: i32) -> (i32, i32) {
    %c0_i32 = arith.constant 0 : i32
    %c0_i32_0 = arith.constant 0 : i32
    return %arg0, %c0_i32 : i32, i32
  }
  func.func @transform_3(%arg0: i32) -> (i32, i32) {
    %c0_i32 = arith.constant 0 : i32
    %c0_i32_0 = arith.constant 0 : i32
    return %arg0, %c0_i32 : i32, i32
  }
  func.func @transform_4(%arg0: i32) -> (i32, i32) {
    %c0_i32 = arith.constant 0 : i32
    %c0_i32_0 = arith.constant 0 : i32
    %c0_i32_1 = arith.constant 0 : i32
    return %c0_i32, %c0_i32_0 : i32, i32
  }
  func.func @transform_5(%arg0: i32) -> (i32, i32) {
    %c0_i32 = arith.constant 0 : i32
    %c0_i32_0 = arith.constant 0 : i32
    %c0_i32_1 = arith.constant 0 : i32
    return %c0_i32, %c0_i32_0 : i32, i32
  }
  func.func @transform_6(%arg0: i32) -> (i32, i32) {
    %c0_i32 = arith.constant 0 : i32
    %c0_i32_0 = arith.constant 0 : i32
    %c0_i32_1 = arith.constant 0 : i32
    return %c0_i32, %c0_i32_0 : i32, i32
  }
  func.func @transform_7(%arg0: i32) -> (i32, i32) {
    %c0_i32 = arith.constant 0 : i32
    %c0_i32_0 = arith.constant 0 : i32
    %c0_i32_1 = arith.constant 0 : i32
    return %c0_i32, %c0_i32_0 : i32, i32
  }
  func.func @transform_8(%arg0: i32) -> (i32, i32) {
    %c0_i32 = arith.constant 0 : i32
    %c0_i32_0 = arith.constant 0 : i32
    %c0_i32_1 = arith.constant 0 : i32
    return %c0_i32, %c0_i32_0 : i32, i32
  }
  func.func @transform_9(%arg0: i32) -> (i32, i32) {
    %c0_i32 = arith.constant 0 : i32
    %c0_i32_0 = arith.constant 0 : i32
    %c0_i32_1 = arith.constant 0 : i32
    return %c0_i32, %c0_i32_0 : i32, i32
  }
  func.func @transform_10(%arg0: i32) -> (i32, i32) {
    %c0_i32 = arith.constant 0 : i32
    %c0_i32_0 = arith.constant 0 : i32
    %c0_i32_1 = arith.constant 0 : i32
    return %c0_i32, %c0_i32_0 : i32, i32
  }
  func.func @transform_11(%arg0: i32) -> (i32, i32) {
    %c0_i32 = arith.constant 0 : i32
    %c0_i32_0 = arith.constant 0 : i32
    %c0_i32_1 = arith.constant 0 : i32
    return %c0_i32, %c0_i32_0 : i32, i32
  }
  func.func @transform_12(%arg0: i32) -> (i32, i32) {
    %c0_i32 = arith.constant 0 : i32
    %c0_i32_0 = arith.constant 0 : i32
    return %arg0, %c0_i32 : i32, i32
  }
}

</mosaic_0001>

<bundles_post_ra>
// kernel: tpu_custom_call.1
= control target key start
LH: loop header
LB: loop body
LE: loop exit
PB: predicated region body
PF: predicated region fallthrough
CT: control target
= control target key end

     0   :  { %17 = vsyncpa [#allocation3], 0  ;;  %s909_s0 = inlined_call_operand.hbm [shape: f32[8,48], index: 0, kind: input, shape index: {}]   ;;  %s910_s1 = inlined_call_operand.hbm [shape: f32[8,48], index: 1, kind: input, shape index: {}]   ;;  %s911_s2 = inlined_call_operand.hbm [shape: f32[8,40], index: 2, kind: input, shape index: {}]   ;;  %s912_s3 = inlined_call_operand.hbm [shape: f32[8,64], index: 3, kind: input, shape index: {}]   ;;  %s913_s4 = inlined_call_operand.vmem [shape: bf16[48,128], index: 4, kind: input, shape index: {}]   ;;  %s914_s5 = inlined_call_operand.vmem [shape: bf16[48,128], index: 5, kind: input, shape index: {}]   ;;  %s915_s6 = inlined_call_operand.hbm [shape: bf16[40,128], index: 6, kind: input, shape index: {}]   ;;  %s916_s7 = inlined_call_operand.vmem [shape: bf16[64,128], index: 7, kind: input, shape index: {}]   ;;  %s917_s8 = inlined_call_operand.vmem [shape: f32[1,128], index: 8, kind: input, shape index: {}]   ;;  %s918_s9 = inlined_call_operand.hbm [shape: f32[128,128], index: 9, kind: input, shape index: {}]   ;;  %s919_s10 = inlined_call_operand.vmem [shape: bf16[128,32], index: 10, kind: input, shape index: {}]   ;;  %s920_s11 = inlined_call_operand.vmem [shape: f32[1,128], index: 11, kind: input, shape index: {}]   ;;  %s921_s12 = inlined_call_operand.vmem [shape: f32[8,1], index: 12, kind: output, shape index: {}]  }
   0x1   :  { %18 = vsyncpa [#allocation5], 0 }
   0x2   :  { %19 = vsyncpa [#allocation8], 0  ;;  %s37_s23 = sshll.u32 %s910_s1, 4  ;;  %s38_s23 = int_to_ptr.hbm [resolvable:$true] %s37_s23 }
   0x3   :  { %20 = vsyncpa [#allocation11], 0  ;;  %s749_s24 = smov [#allocation4]   ;;  %s59_s28 = sshll.u32 %s912_s3, 4  ;;  %s60_s28 = int_to_ptr.hbm [resolvable:$true] %s59_s28 }
   0x4   :  { %s39_s25 = sshll.u32 %s749_s24, 4  ;;  %s750_s29 = smov [#allocation7]   ;;  %s40_s25 = int_to_ptr.vmem [resolvable:$true] %s39_s25 }
   0x5   :  { %42 = dma.hbm_to_vmem [thread:$0]  %s38_s23, 128, %s40_s25, [#allocation5]  }
   0x6   :  { %s61_s30 = sshll.u32 %s750_s29, 4  ;;  %s26_s15 = sshll.u32 %s909_s0, 4  ;;  %s62_s30 = int_to_ptr.vmem [resolvable:$true] %s61_s30  ;;  %s27_s15 = int_to_ptr.hbm [resolvable:$true] %s26_s15 }
   0x7   :  { %64 = dma.hbm_to_vmem [thread:$0]  %s60_s28, 128, %s62_s30, [#allocation8]  }
   0x8   :  { %s48_s17 = sshll.u32 %s911_s2, 4  ;;  %s751_s18 = smov [#allocation2]   ;;  %s49_s17 = int_to_ptr.hbm [resolvable:$true] %s48_s17 }
   0x9   :  { %s28_s19 = sshll.u32 %s751_s18, 4  ;;  %s752_s3 = smov [#allocation6]   ;;  %s29_s19 = int_to_ptr.vmem [resolvable:$true] %s28_s19 }
   0xa   :  { %31 = dma.hbm_to_vmem [thread:$0]  %s27_s15, 128, %s29_s19, [#allocation3]  }
   0xb   :  { %s50_s20 = sshll.u32 %s752_s3, 4  ;;  %s73_s23 = sshll.u32 %s915_s6, 4  ;;  %s51_s20 = int_to_ptr.vmem [resolvable:$true] %s50_s20  ;;  %s74_s23 = int_to_ptr.hbm [resolvable:$true] %s73_s23 }
   0xc   :  { %53 = dma.hbm_to_vmem [thread:$0]  %s49_s17, 128, %s51_s20, [#allocation5]  }
   0xd   :  { %s753_s0 = smov [#allocation9]   ;;  %s90_s2 = sshll.u32 %s918_s9, 4  ;;  %s91_s2 = int_to_ptr.hbm [resolvable:$true] %s90_s2 }
   0xe   :  { %s75_s24 = sshll.u32 %s753_s0, 4  ;;  %s754_s27 = smov 64   ;;  %s76_s24 = int_to_ptr.vmem [resolvable:$true] %s75_s24 }
   0xf   :  { %s755_s28 = smov 4   ;;  %s756_s29 = smov [#allocation10]  }
  0x10   :  { %81 = dma.hbm_to_vmem [thread:$0]  %s74_s23, 320, %s76_s24, [#allocation8], %s754_s27, %s754_s27, %s755_s28  }
  0x11   :  { %s92_s30 = sshll.u32 %s756_s29, 4  ;;  %s757_s6 = smov 128   ;;  %s93_s30 = int_to_ptr.vmem [resolvable:$true] %s92_s30 }
  0x12   :  { %s758_s13 = smov 8  }
  0x13   :  { %98 = dma.hbm_to_vmem [thread:$0]  %s91_s2, 2048, %s93_s30, [#allocation11], %s757_s6, %s757_s6, %s758_s13  }
  0x14   :  { %741 = dma.done.wait [#allocation3], 128  }
  0x15   :  { %742 = vsyncadd [#allocation3], 4294967168 }
  0x16   :  { %743 = dma.done.wait [#allocation5], 256  }
  0x17   :  { %744 = vsyncadd [#allocation5], 4294967040 }
  0x18   :  { %745 = dma.done.wait [#allocation8], 448  }
  0x19   :  { %746 = vsyncadd [#allocation8], 4294966848 }
  0x1a   :  { %747 = dma.done.wait [#allocation11], 2048  }
  0x1b   :  { %748 = vsyncadd [#allocation11], 4294965248  ;;  %v565_v0 = vld [vmem:[%s914_s5 + $0x10] sm:$0xff]  ;;  %v564_v2 = vld [vmem:[%s914_s5 + $0x8] sm:$0xff]  ;;  %vm239_vm0 = vcmask 1043456   ;;  %vm162_vm1 = vcmask 392192  }
  0x1c   :  { %v562_v1 = vld [vmem:[%s913_s4 + $0x10] sm:$0xff]  ;;  %171 = vmatpush.bf16.msra.mxu3 %v565_v0  ;;  %v561_v3 = vld [vmem:[%s913_s4 + $0x8] sm:$0xff]  ;;  %v563_v6 = vld [vmem:[%s914_s5] sm:$0xff]  ;;  %vm235_vm2 = vcmask 326656   ;;  %vm291_vm3 = vcmask 523264   ;;  %s759_s0 = smov 96  }
  0x1d   :  { %205 = vmatpush.bf16.msra.mxu2 %v562_v1  ;;  %v219_v4 = vld [vmem:[#allocation9 + $0x10] sm:$0xf]  ;;  %v560_v7 = vld [vmem:[%s913_s4] sm:$0xff]  ;;  %v136_v9 = vld [vmem:[#allocation4] sm:$0xff]  ;;  %vm457_vm8 = vcmask 261120   ;;  %vm466_vm9 = vcmask 7168  }
  0x1e   :  { %v229_v5 = vunpack.c.l.b16 %v219_v4  ;;  %v128_v10 = vld [vmem:[#allocation2] sm:$0xff]  ;;  %v571_v11 = vld [vmem:[%s916_s7 + $0x18] sm:$0xff]  ;;  %v137_v13 = vpack.c.bf16 %v136_v9, %v136_v9  ;;  %v570_v15 = vld [vmem:[%s916_s7 + $0x10] sm:$0xff] }
  0x1f   :  { %v129_v14 = vpack.c.bf16 %v128_v10, %v128_v10  ;;  %v567_v16 = vld [vmem:[#allocation9 + $0x8] sm:$0xff]  ;;  %v566_v18 = vld [vmem:[#allocation9] sm:$0xff]  ;;  %v213_v20 = vld [vmem:[#allocation6] sm:$0xff] }
  0x20   :  { %v232_v8 = vpack.c.b16 %v229_v5, %v229_v5  ;;  %172 = vmatpush.bf16.msra.mxu3 %v564_v2  ;;  %v569_v17 = vld [vmem:[%s916_s7 + $0x8] sm:$0xff]  ;;  %v568_v19 = vld [vmem:[%s916_s7] sm:$0xff]  ;;  %v257_v21 = vld [vmem:[#allocation7] sm:$0xff]  ;;  %v214_v22 = vpack.c.bf16 %v213_v20, %v213_v20 }
  0x21   :  { %206 = vmatpush.bf16.msra.mxu2 %v561_v3  ;;  %v258_v23 = vpack.c.bf16 %v257_v21, %v257_v21  ;;  %v334_v24 = vld [vmem:[#allocation10 + $0x78] sm:$0xff]  ;;  %v333_v25 = vld [vmem:[#allocation10 + $0x70] sm:$0xff]  ;;  %v332_v26 = vld [vmem:[#allocation10 + $0x68] sm:$0xff] }
  0x22   :  { %v241_v12 = vsel %vm239_vm0, %v232_v8, 0  ;;  %335 = vmatpush.msra.mxu0 %v334_v24  ;;  %v331_v27 = vld [vmem:[#allocation10 + $0x60] sm:$0xff]  ;;  %v330_v28 = vld [vmem:[#allocation10 + $0x58] sm:$0xff]  ;;  %v329_v31 = vld [vmem:[#allocation10 + $0x50] sm:$0xff] }
  0x23   :  { %v328_v32 = vld [vmem:[#allocation10 + $0x48] sm:$0xff]  ;;  %v327_v33 = vld [vmem:[#allocation10 + $0x40] sm:$0xff]  ;;  %v326_v34 = vld [vmem:[#allocation10 + $0x38] sm:$0xff] }
  0x24   :  { %173 = vmatpush.bf16.msra.mxu3 %v563_v6  ;;  %336 = vmatpush.msra.mxu0 %v333_v25  ;;  %v325_v37 = vld [vmem:[#allocation10 + $0x30] sm:$0xff]  ;;  %v591_v42 = vld [vmem:[%s917_s8] ss:$0 sm:$0xff]  ;;  %v323_v48 = vld [vmem:[#allocation10 + $0x20] sm:$0xff] }
  0x25   :  { %207 = vmatpush.bf16.msra.mxu2 %v560_v7  ;;  %v324_v47 = vld [vmem:[#allocation10 + $0x28] sm:$0xff]  ;;  %v322_v49 = vld [vmem:[#allocation10 + $0x18] sm:$0xff]  ;;  %v321_v50 = vld [vmem:[#allocation10 + $0x10] sm:$0xff] }
  0x26   :  { %337 = vmatpush.msra.mxu0 %v332_v26  ;;  %v320_v51 = vld [vmem:[#allocation10 + $0x8] sm:$0xff]  ;;  %v319_v52 = vld [vmem:[#allocation10] sm:$0xff]  ;;  %v577_v55 = vld [vmem:[%s919_s10 + $0x28] sm:$0xff] }
  0x27   :  { %488 = vmatmul.msk.bf16.vlgmr.msra.gmra.mxu3 %vm162_vm1, %v137_v13  ;;  %v579_v53 = vld [vmem:[%s919_s10 + $0x38] sm:$0xff]  ;;  %v578_v54 = vld [vmem:[%s919_s10 + $0x30] sm:$0xff]  ;;  %v576_v60 = vld [vmem:[%s919_s10 + $0x20] sm:$0xff] }
  0x28   :  { %299 = vmatpush.bf16.msrb.mxu3 %v571_v11  ;;  %501 = vmatmul.msk.bf16.vlgmr.msra.gmra.mxu2 %vm162_vm1, %v129_v14  ;;  %v575_v61 = vld [vmem:[%s919_s10 + $0x18] sm:$0xff]  ;;  %v574_v62 = vld [vmem:[%s919_s10 + $0x10] sm:$0xff]  ;;  %v573_v63 = vld [vmem:[%s919_s10 + $0x8] sm:$0xff] }
  0x29   :  { %248 = vmatpush.bf16.msrb.mxu2 %v241_v12  ;;  %338 = vmatpush.msra.mxu0 %v331_v27  ;;  %v572_v0 = vld [vmem:[%s919_s10] sm:$0xff] }
  0x2a   :  { %439 = vmatpush.bf16.msra.mxu1 %v579_v53  ;;  %v592_v1 = vld [vmem:[%s920_s11] ss:$0 sm:$0xff] }
  0x2b   :  { %339 = vmatpush.msra.mxu0 %v330_v28 }
  0x2c   :  { %300 = vmatpush.bf16.msrb.mxu3 %v570_v15 }
  0x2d   :  { %249 = vmatpush.bf16.msrb.mxu2 %v567_v16  ;;  %340 = vmatpush.msra.mxu0 %v329_v31 }
  0x2e   :  { %440 = vmatpush.bf16.msra.mxu1 %v578_v54 }
  0x2f   :  { %341 = vmatpush.msra.mxu0 %v328_v32 }
  0x30   :  { %301 = vmatpush.bf16.msrb.mxu3 %v569_v17 }
  0x31   :  { %250 = vmatpush.bf16.msrb.mxu2 %v566_v18  ;;  %342 = vmatpush.msra.mxu0 %v327_v33 }
  0x32   :  { %441 = vmatpush.bf16.msra.mxu1 %v577_v55 }
  0x33   :  { %343 = vmatpush.msra.mxu0 %v326_v34 }
  0x34   :  { %302 = vmatpush.bf16.msrb.mxu3 %v568_v19 }
  0x35   :  { %344 = vmatpush.msra.mxu0 %v325_v37 }
  0x36   :  { %442 = vmatpush.bf16.msra.mxu1 %v576_v60 }
  0x37   :  { %527 = vmatmul.msk.bf16.vlgmr.msrb.gmra.mxu3 %vm291_vm3, %v258_v23  ;;  %345 = vmatpush.msra.mxu0 %v324_v47 }
  0x38   :  { %510 = vmatmul.msk.bf16.vlgmr.msrb.gmra.mxu2 %vm235_vm2, %v214_v22 }
  0x39   :  { %346 = vmatpush.msra.mxu0 %v323_v48 }
  0x3a   :  { %443 = vmatpush.bf16.msra.mxu1 %v575_v61 }
  0x3b   :  { %347 = vmatpush.msra.mxu0 %v322_v49 }
  0x3d   :  { %348 = vmatpush.msra.mxu0 %v321_v50 }
  0x3e   :  { %444 = vmatpush.bf16.msra.mxu1 %v574_v62 }
  0x3f   :  { %349 = vmatpush.msra.mxu0 %v320_v51 }
  0x41   :  { %350 = vmatpush.msra.mxu0 %v319_v52 }
  0x42   :  { %445 = vmatpush.bf16.msra.mxu1 %v573_v63 }
  0x46   :  { %446 = vmatpush.bf16.msra.mxu1 %v572_v0 }
  0xaa   :  { %v175_v29 = vpop.f32.mrf.mxu3 }
  0xab   :  { %v209_v30 = vpop.f32.mrf.mxu2 }
  0xac   :  { %v210_v38 = vadd.f32 %v209_v30, %v175_v29 }
  0xb2   :  { %v177_v35 = vpop.f32.mrf.mxu3 }
  0xb3   :  { %v211_v36 = vpop.f32.mrf.mxu2 }
  0xba   :  { %v304_v40 = vpop.f32.mrf.mxu3 }
  0xbb   :  { %v252_v39 = vpop.f32.mrf.mxu2 }
  0xbc   :  { %v256_v41 = vadd.f32 %v252_v39, %v210_v38 }
  0xbe   :  { %v308_v43 = vadd.f32 %v304_v40, %v256_v41 }
  0xc0   :  { %v313_v44 = vadd.f32 %v591_v42, %v308_v43 }
  0xc2   :  { %314 = vmax.xlane.f32.xlu0 %v313_v44  ;;  %v306_v46 = vpop.f32.mrf.mxu3 }
  0xc3   :  { %v254_v45 = vpop.f32.mrf.mxu2 }
  0xd6   :  { %453 = vrot.lane.b32.xlu0 %v592_v1, %s759_s0 }
 0x135   :  { %v315_v56 = vpop.xlane.xlu0 %314 }
 0x136   :  { %v316_v57 = vsub.f32 %v313_v44, %v315_v56 }
 0x138   :  { %v317_v58 = vmul.f32 1.442695, %v316_v57 }
 0x13a   :  { %593 = vpow2.f32 %v317_v58 }
 0x140   :  { %v594_v59 = vpop.eup %593 }
 0x141   :  { %351 = vmatmul.f32.vlgmr.msra.gmra.mxu0 %v594_v59 }
 0x148   :  { %v454_v17 = vpop.permute.xlu0 %453 }
 0x1be   :  { %v352_v2 = vpop.f32.mrf.mxu0 }
 0x1bf   :  { %595 = vrcp.f32 %v352_v2  ;;  %v366_v6 = vand.u32 2147483648, %v352_v2  ;;  %v364_v8 = vand.u32 2147483647, %v352_v2  ;;  %vm360_vm5 = vweird.f32 %v352_v2 }
 0x1c1   :  { %v367_v10 = vor.u32 1.1754944e-38, %v366_v6  ;;  %vm365_vm7 = vcmp.eq.f32.partialorder %v364_v8, 8.507059e+37 }
 0x1c5   :  { %v596_v3 = vpop.eup %595 }
 0x1c6   :  { %v356_v4 = vmul.f32 %v596_v3, %v352_v2  ;;  %vm361_vm4 = vweird.f32 %v596_v3 }
 0x1c7   :  { %vm362_vm6 = vmor %vm360_vm5, %vm361_vm4 }
 0x1c8   :  { %v357_v5 = vsub.f32 1.0, %v356_v4 }
 0x1ca   :  { %v358_v7 = vmul.f32 %v596_v3, %v357_v5 }
 0x1cc   :  { %v359_v9 = vadd.f32 %v596_v3, %v358_v7 }
 0x1ce   :  { %v363_v11 = vsel %vm362_vm6, %v596_v3, %v359_v9 }
 0x1cf   :  { %v368_v12 = vsel %vm365_vm7, %v367_v10, %v363_v11 }
 0x1d0   :  { %v369_v13 = vmul.f32 %v594_v59, %v368_v12 }
 0x1d2   :  { %v371_v14 = vpack.c.bf16 %v369_v13, %v369_v13 }
 0x1d4   :  { %447 = vmatmul.bf16.vlgmr.msra.gmra.mxu1 %v371_v14 }
 0x251   :  { %v448_v15 = vpop.f32.mrf.mxu1 }
 0x252   :  { %v449_v16 = vadd.f32 %v592_v1, %v448_v15 }
 0x254   :  { %v452_v18 = vmax.f32 %v449_v16, 0.0 }
 0x256   :  { %v456_v19 = vmul.f32 %v454_v17, %v452_v18 }
 0x258   :  { %v458_v20 = vsel %vm457_vm8, %v456_v19, 0.0 }
 0x259   :  { %v450_v21 = vpop.f32.mrf.mxu1  ;;  %459 = vadd.xlane.f32.xlu1 %v458_v20 }
 0x2cc   :  { %v460_v22 = vpop.xlane.xlu1 %459 }
 0x2cd   :  { %v461_v23 = vadd.f32 %v592_v1, %v460_v22 }
 0x2cf   :  { %463 = vrot.lane.b32.xlu1 %v461_v23, %s754_s27 }
 0x341   :  { %v464_v24 = vpop.permute.xlu1 %463 }
 0x342   :  { %467 = vst.msk [vmem:[%s921_s12] sm:$0xff] %vm466_vm9, %v464_v24 }
 0x343   :  { %472 = vsyncpa [#allocation3], 1 }
 0x344   :  { %473 = vsyncpa [#allocation5], 1 }
 0x345   :  { %474 = vsyncpa [#allocation8], 1 }
 0x346   :  { %475 = vsyncpa [#allocation11], 1 }

</bundles_post_ra>
